<compile_context>
chip_gen: v6e
topology: v6e:2x2x1
jax: 0.10.0
libtpu: 0.0.40
codegen_flags: <defaults>
</compile_context>

<pallas_src>
import jax
import jax.numpy as jnp
from jax.experimental import pallas as pl
from jax.experimental.pallas import tpu as pltpu


def _round_up(x: int, m: int) -> int:
    return ((x + m - 1) // m) * m


def _make_mlp_kernel(num_hidden_layers: int, final_reduce: bool,
                     negative_slope: float = 0.01):
    """Fused MLP kernel: `num_hidden_layers` (Linear+LeakyReLU) + 1 output Linear."""

    def kernel(*refs):
        x_ref = refs[0]
        out_ref = refs[-1]
        param_refs = refs[1:-1]  # interleaved (w0, b0, w1, b1, ..., wl, bl)

        h = x_ref[...].astype(jnp.float32)

        # Hidden layers: MXU matmul + VPU bias add, LeakyReLU on the VPU.
        for i in range(num_hidden_layers):
            w = param_refs[2 * i][...].astype(jnp.float32)
            b = param_refs[2 * i + 1][...].astype(jnp.float32)
            h = jnp.dot(h, w, preferred_element_type=jnp.float32) + b
            h = jnp.maximum(h, negative_slope * h)  # LeakyReLU (0 < slope < 1)

        w_last = param_refs[-2][...].astype(jnp.float32)
        b_last = param_refs[-1][...].astype(jnp.float32)
        if final_reduce:
            # out_nodes == 1: w_last arrives pre-transposed as [1, h_last].
            # VPU multiply + XLU lane-reduce instead of an N=1 MXU matmul.
            out = jnp.sum(h * w_last, axis=-1, keepdims=True) + b_last
        else:
            out = jnp.dot(h, w_last, preferred_element_type=jnp.float32) + b_last
        out_ref[...] = out.astype(out_ref.dtype)

    return kernel


def discriminator_forward(x, weights, biases, *, tile_b: int = 1024):
    """Run the Discriminator forward pass as one fused, batch-gridded Pallas kernel.

    Args:
      x:        [batch, in_nodes] float32
      weights:  list of [in_dim, out_dim] arrays (already transposed vs PyTorch)
      biases:   list of [1, out_dim] arrays
    Returns:
      [batch, out_nodes] float32
    """
    assert len(weights) == len(biases)
    num_hidden = len(weights) - 1
    batch, in_dim = x.shape
    out_nodes = weights[-1].shape[1]
    final_reduce = (out_nodes == 1)

    # Batch tile: multiple of 8 (f32 sublane), capped at the (8-padded) batch.
    # Even at 1024 rows a double-buffered (TILE_B, in_dim) f32 block plus all
    # params is far below the v7x 64 MiB / v5e-v6e 128 MiB VMEM.
    b8 = _round_up(batch, 8)
    tile_b = max(8, min(_round_up(tile_b, 8), b8))
    b_pad = _round_up(batch, tile_b)
    if b_pad != batch:
        x = jnp.pad(x, ((0, b_pad - batch), (0, 0)))

    # Interleave params; pre-transpose the final [h_last, 1] weight to [1, h_last]
    # on the host so the kernel's reduce path is a plain row broadcast (no
    # in-kernel XLU transpose).
    params = []
    for i, (w, b) in enumerate(zip(weights, biases)):
        if final_reduce and i == num_hidden:
            w = w.reshape(1, w.shape[0])
        params.append(w)
        params.append(b)

    grid = (b_pad // tile_b,)

    in_specs = [pl.BlockSpec((tile_b, in_dim), lambda i: (i, 0))]
    # Parameters: full-array blocks, constant index -> fetched once, VMEM-resident.
    for p in params:
        in_specs.append(pl.BlockSpec(p.shape, lambda i: (0, 0)))
    out_specs = pl.BlockSpec((tile_b, out_nodes), lambda i: (i, 0))

    itemsize = jnp.dtype(x.dtype).itemsize
    flops = 2 * b_pad * sum(int(w.size) for w in weights)
    bytes_accessed = (
        b_pad * in_dim * itemsize
        + b_pad * out_nodes * itemsize
        + sum(int(p.size) * jnp.dtype(p.dtype).itemsize for p in params)
    )

    kernel = _make_mlp_kernel(num_hidden, final_reduce)

    out = pl.pallas_call(
        kernel,
        out_shape=jax.ShapeDtypeStruct((b_pad, out_nodes), x.dtype),
        grid=grid,
        in_specs=in_specs,
        out_specs=out_specs,
        compiler_params=pltpu.CompilerParams(
            dimension_semantics=("parallel",)),  # megacore sharding
        cost_estimate=pl.CostEstimate(
            flops=flops, transcendentals=0, bytes_accessed=bytes_accessed),
    )(x, *params)

    return out[:batch]


def init_discriminator_params(key, in_nodes, hidden_nodes, out_nodes):
    """Deterministic init mirroring nn.Linear's default U(-1/sqrt(fan_in), 1/sqrt(fan_in))."""
    dims = [in_nodes] + list(hidden_nodes) + [out_nodes]
    weights, biases = [], []
    for i in range(len(dims) - 1):
        fan_in, fan_out = dims[i], dims[i + 1]
        key, kw, kb = jax.random.split(key, 3)
        bound = 1.0 / jnp.sqrt(jnp.float32(fan_in))
        # stored as [in, out] so the kernel does x @ W
        w = jax.random.uniform(kw, (fan_in, fan_out), jnp.float32, -bound, bound)
        b = jax.random.uniform(kb, (1, fan_out), jnp.float32, -bound, bound)
        weights.append(w)
        biases.append(b)
    return weights, biases


def discriminator_reference(x, weights, biases):
    """Plain-JAX reference matching PyTorch semantics."""
    h = x
    n = len(weights)
    for i, (w, b) in enumerate(zip(weights, biases)):
        h = h @ w + b
        if i < n - 1:
            h = jnp.where(h > 0, h, 0.01 * h)
    return h


if __name__ == "__main__":
    # Shapes consistent with the module: in_nodes=16, hidden=[32, 32], out_nodes=1
    in_nodes = 16
    hidden_nodes = [32, 32]
    out_nodes = 1

    key = jax.random.PRNGKey(0)
    key, kx = jax.random.split(key)
    weights, biases = init_discriminator_params(key, in_nodes, hidden_nodes, out_nodes)

    # Small case (single grid step).
    x_small = jax.random.normal(kx, (8, in_nodes), jnp.float32)
    out_small = jax.block_until_ready(discriminator_forward(x_small, weights, biases))
    ref_small = discriminator_reference(x_small, weights, biases)
    assert out_small.shape == (8, out_nodes), out_small.shape
    assert jnp.allclose(out_small, ref_small, atol=1e-5, rtol=1e-5)

    # Non-multiple batch exercising the grid, pipelining and padding path.
    key, kx2 = jax.random.split(key)
    x_big = jax.random.normal(kx2, (300, in_nodes), jnp.float32)
    out_big = jax.block_until_ready(
        discriminator_forward(x_big, weights, biases, tile_b=128))
    ref_big = discriminator_reference(x_big, weights, biases)
    assert out_big.shape == (300, out_nodes), out_big.shape
    assert jnp.allclose(out_big, ref_big, atol=1e-5, rtol=1e-5)

    # TODO(synk): gradient_penalty uses autograd.grad w.r.t. inputs; it is a
    # training-time helper, not part of forward(), so it is left to jax.grad
    # around `discriminator_forward` outside the kernel.
    print("KERNEL_OK")
</pallas_src>

<mosaic_0001>
module attributes {stable_mosaic.version = 11 : i64} {
  func.func @kernel(%arg0: i32, %arg1: memref<8x16xf32, #tpu.memory_space<vmem>>, %arg2: memref<16x32xf32, #tpu.memory_space<vmem>>, %arg3: memref<1x32xf32, #tpu.memory_space<vmem>>, %arg4: memref<32x32xf32, #tpu.memory_space<vmem>>, %arg5: memref<1x32xf32, #tpu.memory_space<vmem>>, %arg6: memref<1x32xf32, #tpu.memory_space<vmem>>, %arg7: memref<1x1xf32, #tpu.memory_space<vmem>>, %arg8: memref<8x1xf32, #tpu.memory_space<vmem>>) attributes {dimension_semantics = [#tpu.dimension_semantics<parallel>], iteration_bounds = array<i64: 1>, scalar_prefetch = 0 : i64, scratch_operands = 0 : i64, tpu.core_type = #tpu.core_type<tc>, window_params = [{transform_indices = @transform_0, window_bounds = array<i64: 8, 16>}, {pipeline_mode = #tpu.pipeline_mode<synchronous>, transform_indices = @transform_1, window_bounds = array<i64: 16, 32>}, {pipeline_mode = #tpu.pipeline_mode<synchronous>, transform_indices = @transform_2, window_bounds = array<i64: 1, 32>}, {pipeline_mode = #tpu.pipeline_mode<synchronous>, transform_indices = @transform_3, window_bounds = array<i64: 32, 32>}, {pipeline_mode = #tpu.pipeline_mode<synchronous>, transform_indices = @transform_4, window_bounds = array<i64: 1, 32>}, {pipeline_mode = #tpu.pipeline_mode<synchronous>, transform_indices = @transform_5, window_bounds = array<i64: 1, 32>}, {pipeline_mode = #tpu.pipeline_mode<synchronous>, transform_indices = @transform_6, window_bounds = array<i64: 1, 1>}, {transform_indices = @transform_7, window_bounds = array<i64: 8, 1>}]} {
    %c0 = arith.constant 0 : index
    %c0_0 = arith.constant 0 : index
    %0 = vector.load %arg1[%c0, %c0_0] : memref<8x16xf32, #tpu.memory_space<vmem>>, vector<8x16xf32>
    %c0_1 = arith.constant 0 : index
    %c0_2 = arith.constant 0 : index
    %1 = vector.load %arg2[%c0_1, %c0_2] : memref<16x32xf32, #tpu.memory_space<vmem>>, vector<16x32xf32>
    %c0_3 = arith.constant 0 : index
    %c0_4 = arith.constant 0 : index
    %2 = vector.load %arg3[%c0_3, %c0_4] : memref<1x32xf32, #tpu.memory_space<vmem>>, vector<1x32xf32>
    %cst = arith.constant dense<0.000000e+00> : vector<8x32xf32>
    %3 = tpu.matmul %0, %1, %cst {dimension_numbers = #tpu.dot_dimension_numbers<[1], [0], [0], [1], [0, 0, 1, 1], [], []>} : vector<8x16xf32>, vector<16x32xf32>, vector<8x32xf32> -> vector<8x32xf32>
    %4 = vector.broadcast %2 : vector<1x32xf32> to vector<8x32xf32>
    %5 = arith.addf %3, %4 : vector<8x32xf32>
    %cst_5 = arith.constant 0.00999999977 : f32
    %6 = vector.broadcast %cst_5 : f32 to vector<8x32xf32>
    %7 = arith.mulf %6, %5 : vector<8x32xf32>
    %8 = arith.maximumf %5, %7 : vector<8x32xf32>
    %c0_6 = arith.constant 0 : index
    %c0_7 = arith.constant 0 : index
    %9 = vector.load %arg4[%c0_6, %c0_7] : memref<32x32xf32, #tpu.memory_space<vmem>>, vector<32x32xf32>
    %c0_8 = arith.constant 0 : index
    %c0_9 = arith.constant 0 : index
    %10 = vector.load %arg5[%c0_8, %c0_9] : memref<1x32xf32, #tpu.memory_space<vmem>>, vector<1x32xf32>
    %cst_10 = arith.constant dense<0.000000e+00> : vector<8x32xf32>
    %11 = tpu.matmul %8, %9, %cst_10 {dimension_numbers = #tpu.dot_dimension_numbers<[1], [0], [0], [1], [0, 0, 1, 1], [], []>} : vector<8x32xf32>, vector<32x32xf32>, vector<8x32xf32> -> vector<8x32xf32>
    %12 = vector.broadcast %10 : vector<1x32xf32> to vector<8x32xf32>
    %13 = arith.addf %11, %12 : vector<8x32xf32>
    %cst_11 = arith.constant 0.00999999977 : f32
    %14 = vector.broadcast %cst_11 : f32 to vector<8x32xf32>
    %15 = arith.mulf %14, %13 : vector<8x32xf32>
    %16 = arith.maximumf %13, %15 : vector<8x32xf32>
    %c0_12 = arith.constant 0 : index
    %c0_13 = arith.constant 0 : index
    %17 = vector.load %arg6[%c0_12, %c0_13] : memref<1x32xf32, #tpu.memory_space<vmem>>, vector<1x32xf32>
    %c0_14 = arith.constant 0 : index
    %c0_15 = arith.constant 0 : index
    %18 = vector.load %arg7[%c0_14, %c0_15] : memref<1x1xf32, #tpu.memory_space<vmem>>, vector<1x1xf32>
    %19 = vector.broadcast %17 : vector<1x32xf32> to vector<8x32xf32>
    %20 = arith.mulf %16, %19 : vector<8x32xf32>
    %cst_16 = arith.constant dense<0.000000e+00> : vector<8xf32>
    %21 = vector.multi_reduction <add>, %20, %cst_16 [1] : vector<8x32xf32> to vector<8xf32>
    %22 = vector.shape_cast %21 : vector<8xf32> to vector<8x1xf32>
    %23 = vector.broadcast %18 : vector<1x1xf32> to vector<8x1xf32>
    %24 = arith.addf %22, %23 : vector<8x1xf32>
    %c0_17 = arith.constant 0 : index
    %c0_18 = arith.constant 0 : index
    %25 = vector.load %arg8[%c0_17, %c0_18] : memref<8x1xf32, #tpu.memory_space<vmem>>, vector<8x1xf32>
    tpu.vector_store %arg8[%c0_17, %c0_18], %24 {strides = array<i32>} : memref<8x1xf32, #tpu.memory_space<vmem>>, vector<8x1xf32>,
    return
  }
  func.func @transform_0(%arg0: i32) -> (i32, i32) {
    %c0_i32 = arith.constant 0 : i32
    %c0_i32_0 = arith.constant 0 : i32
    return %arg0, %c0_i32 : i32, i32
  }
  func.func @transform_1(%arg0: i32) -> (i32, i32) {
    %c0_i32 = arith.constant 0 : i32
    %c0_i32_0 = arith.constant 0 : i32
    %c0_i32_1 = arith.constant 0 : i32
    return %c0_i32, %c0_i32_0 : i32, i32
  }
  func.func @transform_2(%arg0: i32) -> (i32, i32) {
    %c0_i32 = arith.constant 0 : i32
    %c0_i32_0 = arith.constant 0 : i32
    %c0_i32_1 = arith.constant 0 : i32
    return %c0_i32, %c0_i32_0 : i32, i32
  }
  func.func @transform_3(%arg0: i32) -> (i32, i32) {
    %c0_i32 = arith.constant 0 : i32
    %c0_i32_0 = arith.constant 0 : i32
    %c0_i32_1 = arith.constant 0 : i32
    return %c0_i32, %c0_i32_0 : i32, i32
  }
  func.func @transform_4(%arg0: i32) -> (i32, i32) {
    %c0_i32 = arith.constant 0 : i32
    %c0_i32_0 = arith.constant 0 : i32
    %c0_i32_1 = arith.constant 0 : i32
    return %c0_i32, %c0_i32_0 : i32, i32
  }
  func.func @transform_5(%arg0: i32) -> (i32, i32) {
    %c0_i32 = arith.constant 0 : i32
    %c0_i32_0 = arith.constant 0 : i32
    %c0_i32_1 = arith.constant 0 : i32
    return %c0_i32, %c0_i32_0 : i32, i32
  }
  func.func @transform_6(%arg0: i32) -> (i32, i32) {
    %c0_i32 = arith.constant 0 : i32
    %c0_i32_0 = arith.constant 0 : i32
    %c0_i32_1 = arith.constant 0 : i32
    return %c0_i32, %c0_i32_0 : i32, i32
  }
  func.func @transform_7(%arg0: i32) -> (i32, i32) {
    %c0_i32 = arith.constant 0 : i32
    %c0_i32_0 = arith.constant 0 : i32
    return %arg0, %c0_i32 : i32, i32
  }
}

</mosaic_0001>

<bundles_post_ra>
// kernel: tpu_custom_call.1
= control target key start
LH: loop header
LB: loop body
LE: loop exit
PB: predicated region body
PF: predicated region fallthrough
CT: control target
= control target key end

     0   :  { %s441_s0 = inlined_call_operand.hbm [shape: f32[8,16], index: 0, kind: input, shape index: {}]   ;;  %s442_s1 = inlined_call_operand.hbm [shape: f32[16,32], index: 1, kind: input, shape index: {}]   ;;  %s443_s2 = inlined_call_operand.vmem [shape: f32[1,32], index: 2, kind: input, shape index: {}]   ;;  %s444_s3 = inlined_call_operand.hbm [shape: f32[32,32], index: 3, kind: input, shape index: {}]   ;;  %s445_s4 = inlined_call_operand.vmem [shape: f32[1,32], index: 4, kind: input, shape index: {}]   ;;  %s446_s5 = inlined_call_operand.vmem [shape: f32[1,32], index: 5, kind: input, shape index: {}]   ;;  %s447_s6 = inlined_call_operand.<no memory space> [shape: f32[1,1], index: 6, kind: input, shape index: {}]   ;;  %s448_s7 = inlined_call_operand.vmem [shape: f32[8,1], index: 7, kind: output, shape index: {}]  }
   0x1   :  { %v12_v0 = vstv %s447_s6 }
   0x2   :  { %13 = vst [vmem:[#allocation2] sm:$0x1] %v12_v0 }
   0x3   :  { %14 = vsyncpa [#allocation4], 0 }
   0x4   :  { %15 = vsyncpa [#allocation6], 0  ;;  %s370_s26 = smov [#allocation5]  }
   0x5   :  { %s31_s27 = sshll.u32 %s370_s26, 4  ;;  %s32_s27 = int_to_ptr.vmem [resolvable:$true] %s31_s27 }
   0x6   :  { %s314_s28 = scalar_lea.vmem %s32_s27, 256  ;;  %p319_p1 = scmp.lt.s32.totalorder %s32_s27, %s32_s27 }
   0x7   :  { %p315_p0 = scmp.ne.s32.totalorder %s32_s27, %s314_s28  ;;  %p320_p2 = scmp.lt.s32.totalorder %s314_s28, %s314_s28 }
   0x9   :  { %p321_p3 = por %p320_p2, %p319_p1 }
   0xb   :  { %p322_p4 = pnand %p321_p3, %p315_p0 }
   0xd   :  { %325 = shalt.err (!%p322_p4)
}
   0xe   :  { %s371_s29 = smov 128   ;;  %s372_s30 = smov 8  }
   0xf   :  { %37 = dma.hbm_to_vmem [thread:$0]  %s442_s1, 256, %s32_s27, [#allocation6], %s371_s29, %s371_s29, %s372_s30  }
  0x10   :  { %s373_s6 = smov [#allocation3]   ;;  %s374_s11 = smov [#allocation7]  }
  0x11   :  { %s22_s10 = sshll.u32 %s373_s6, 4  ;;  %s45_s12 = sshll.u32 %s374_s11, 4  ;;  %s23_s10 = int_to_ptr.vmem [resolvable:$true] %s22_s10  ;;  %s46_s12 = int_to_ptr.vmem [resolvable:$true] %s45_s12 }
  0x12   :  { %s334_s13 = scalar_lea.vmem %s23_s10, 128  ;;  %p339_p6 = scmp.lt.s32.totalorder %s23_s10, %s23_s10 }
  0x13   :  { %p335_p5 = scmp.ne.s32.totalorder %s23_s10, %s334_s13  ;;  %p340_p7 = scmp.lt.s32.totalorder %s334_s13, %s334_s13 }
  0x15   :  { %p341_p8 = por %p340_p7, %p339_p6 }
  0x17   :  { %p342_p9 = pnand %p341_p8, %p335_p5 }
  0x19   :  { %345 = shalt.err (!%p342_p9)
}
  0x1a   :  { %25 = dma.hbm_to_vmem [thread:$0]  %s441_s0, 128, %s23_s10, [#allocation4]  }
  0x1b   :  { %s354_s16 = scalar_lea.vmem %s46_s12, 512  ;;  %p359_p11 = scmp.lt.s32.totalorder %s46_s12, %s46_s12 }
  0x1c   :  { %p355_p10 = scmp.ne.s32.totalorder %s46_s12, %s354_s16  ;;  %p360_p12 = scmp.lt.s32.totalorder %s354_s16, %s354_s16 }
  0x1e   :  { %p361_p13 = por %p360_p12, %p359_p11 }
  0x20   :  { %p362_p0 = pnand %p361_p13, %p355_p10 }
  0x22   :  { %365 = shalt.err (!%p362_p0)
}
  0x23   :  { %51 = dma.hbm_to_vmem [thread:$0]  %s444_s3, 512, %s46_s12, [#allocation6], %s371_s29, %s371_s29, %s372_s30  }
  0x24   :  { %366 = dma.done.wait [#allocation4], 128  }
  0x25   :  { %367 = vsyncadd [#allocation4], 4294967168 }
  0x26   :  { %368 = dma.done.wait [#allocation6], 768  }
  0x27   :  { %369 = vsyncadd [#allocation6], 4294966528  ;;  %v375_v1 = vmov 0.0   ;;  %vm376_vm0 = vmmov 0   ;;  %v69_v2 = vld [vmem:[#allocation5 + $0x8] sm:$0xff]  ;;  %v68_v3 = vld [vmem:[#allocation5] sm:$0xff] }
  0x28   :  { %281 = vmatprep.subr.mxu0 %v375_v1  ;;  %285 = vmatprep.mubr.msk.f32.mxu0 %vm376_vm0, %v375_v1  ;;  %v67_v4 = vld [vmem:[#allocation3] sm:$0xff]  ;;  %vm77_vm1 = vcmask 130048   ;;  %v156_v5 = vld [vmem:[#allocation7 + $0x18] sm:$0xff]  ;;  %v155_v6 = vld [vmem:[#allocation7 + $0x10] sm:$0xff]  ;;  %vm164_vm2 = vcmask 261120   ;;  %vm259_vm3 = vcmask 7168  }
  0x29   :  { %288 = vmatprep.subr.mxu1 %v375_v1  ;;  %296 = vmatprep.mubr.msk.f32.mxu1 %vm376_vm0, %v375_v1  ;;  %v154_v7 = vld [vmem:[#allocation7 + $0x8] sm:$0xff]  ;;  %v153_v8 = vld [vmem:[#allocation7] sm:$0xff] }
  0x2a   :  { %282 = vmatpush3.msra.mxu0 %v69_v2  ;;  %289 = vmatpush3.msra.mxu1 %v156_v5  ;;  %v267_v9 = vld [vmem:[%s443_s2] ss:$0 sm:$0xff] }
  0x2b   :  { %283 = vmatprep.subr.mxu0 %v375_v1  ;;  %290 = vmatprep.subr.mxu1 %v375_v1  ;;  %v269_v15 = vld [vmem:[%s445_s4] ss:$0 sm:$0xff] }
  0x2c   :  { %284 = vmatpush3.msra.mxu0 %v68_v3  ;;  %291 = vmatpush3.msra.mxu1 %v155_v6  ;;  %v271_v20 = vld [vmem:[%s446_s5] ss:$0 sm:$0xff] }
  0x2d   :  { %286 = vmatmul.mubr.msk.f32.vlgmr.msra.gmra.mxu0 %vm77_vm1, %v67_v4  ;;  %292 = vmatprep.subr.mxu1 %v375_v1  ;;  %v272_v24 = vld [vmem:[#allocation2] ss:$0 sm:$0xff] }
  0x2e   :  { %293 = vmatpush3.msra.mxu1 %v154_v7 }
  0x2f   :  { %294 = vmatprep.subr.mxu1 %v375_v1 }
  0x30   :  { %295 = vmatpush3.msra.mxu1 %v153_v8 }
  0xed   :  { %v147_v10 = vpop.f32.mrf.mxu0 }
  0xee   :  { %v148_v11 = vadd.f32 %v267_v9, %v147_v10 }
  0xef   :  { %v287_v12 = vpop.f32.mrf.mxu0 }
  0xf0   :  { %v151_v13 = vmul.f32 0.01, %v148_v11 }
  0xf2   :  { %v152_v14 = vmax.f32 %v148_v11, %v151_v13 }
  0xf4   :  { %297 = vmatmul.mubr.msk.f32.vlgmr.msra.gmra.mxu1 %vm164_vm2, %v152_v14 }
 0x1b4   :  { %v234_v16 = vpop.f32.mrf.mxu1 }
 0x1b5   :  { %v235_v17 = vadd.f32 %v269_v15, %v234_v16 }
 0x1b6   :  { %v298_v18 = vpop.f32.mrf.mxu1 }
 0x1b7   :  { %v238_v19 = vmul.f32 0.01, %v235_v17 }
 0x1b9   :  { %v239_v21 = vmax.f32 %v235_v17, %v238_v19 }
 0x1bb   :  { %v248_v22 = vmul.f32 %v271_v20, %v239_v21 }
 0x1bd   :  { %v249_v23 = vsel %vm164_vm2, %v248_v22, 0.0 }
 0x1be   :  { %250 = vadd.xlane.f32.xlu0 %v249_v23 }
 0x247   :  { %v251_v25 = vpop.xlane.xlu0 %250 }
 0x248   :  { %v258_v26 = vadd.f32 %v272_v24, %v251_v25 }
 0x24a   :  { %260 = vst.msk [vmem:[%s448_s7] sm:$0xff] %vm259_vm3, %v258_v26 }
 0x24b   :  { %265 = vsyncpa [#allocation4], 1 }
 0x24c   :  { %266 = vsyncpa [#allocation6], 1 }

</bundles_post_ra>
